<compile_context>
chip_gen: v5e
topology: v5e:2x2
jax: 0.10.0
libtpu: 0.0.40
codegen_flags: <defaults>
</compile_context>

<pallas_src>
import functools

import jax
import jax.numpy as jnp
from jax.experimental import pallas as pl
from jax.experimental.pallas import tpu as pltpu

EPS = 1e-5

# v7x has 64 MiB VMEM per TensorCore (128 MiB on v5e/v6e); the default scoped
# limit is 16-32 MiB.  48 MiB leaves headroom on every generation.
_VMEM_LIMIT_BYTES = 48 * 1024 * 1024
_TILE_BUDGET_BYTES = 32 * 1024 * 1024  # budget for the double-buffered tiles


def _stats_kernel(x_ref, w_ref, stats_ref):
    """Partial per-channel sum / sum-of-squares of y = w @ x for one tile."""
    # (hid, C) @ (C, tile_hw) on the MXU, bf16 inputs, f32 accumulation.
    y = jnp.dot(w_ref[...], x_ref[...], preferred_element_type=jnp.float32)
    s1 = jnp.sum(y, axis=1, keepdims=True)       # (hid, 1)  -- lane reduce (XLU)
    s2 = jnp.sum(y * y, axis=1, keepdims=True)   # (hid, 1)
    stats_ref[...] = jnp.concatenate([s1, s2], axis=1)        # (hid, 2)


def _apply_kernel(x_ref, w_ref, ss_ref, o_ref):
    """Recompute y = w @ x; apply folded BN affine + ReLU; lane-dense store."""
    y = jnp.dot(w_ref[...], x_ref[...], preferred_element_type=jnp.float32)
    scale = ss_ref[0]                            # (hid, 1), f32
    shift = ss_ref[1]                            # (hid, 1), f32
    o_ref[...] = jnp.maximum(y * scale + shift, 0.0).astype(o_ref.dtype)


def _pick_tile_hw(hw, c, hid, out_itemsize):
    """Largest HW tile that is a multiple of 128, divides HW and fits budget."""
    if hw % 128 != 0:
        return hw  # full-extent trailing block is always legal
    # Bytes per lane of tile: double-buffered bf16 x block + out block.
    per_lane = 2 * (c * 2 + hid * out_itemsize)
    cap = min(hw, 32768, max(128, (_TILE_BUDGET_BYTES // per_lane) // 128 * 128))
    tile = 128
    t = 256
    while t <= cap:
        if hw % t == 0:
            tile = t
        t += 128
    return tile


@jax.jit
def cnn_feedforward(x_nchw, conv_w, gamma, beta):
    """x_nchw: (N, C, H, W); conv_w: (hid, C, 1, 1); gamma/beta: (hid,)."""
    N, C, H, W = x_nchw.shape
    hid = conv_w.shape[0]
    HW = H * W
    out_dtype = x_nchw.dtype

    # Pure reshapes + dtype casts only -- no HBM transposes.
    x3d = x_nchw.reshape(N, C, HW).astype(jnp.bfloat16)   # MXU-native, halves x bytes
    w2d = conv_w.reshape(hid, C).astype(jnp.bfloat16)

    tile_hw = _pick_tile_hw(HW, C, hid, jnp.dtype(out_dtype).itemsize)
    T = HW // tile_hw

    cparams = pltpu.CompilerParams(
        dimension_semantics=("parallel", "parallel"),
        vmem_limit_bytes=_VMEM_LIMIT_BYTES,
    )

    # ---- Pass 1: per-(batch, tile) partial BN stats; y never hits HBM. ----
    partial_stats = pl.pallas_call(
        _stats_kernel,
        out_shape=jax.ShapeDtypeStruct((N, T, hid, 2), jnp.float32),
        grid=(N, T),
        in_specs=[
            # TODO(synk): if DMA is still exposed on big shapes, add
            # pipeline_mode=pl.Buffered(3) here (trade against VMEM on v7x).
            pl.BlockSpec((None, C, tile_hw), lambda n, t: (n, 0, t)),
            pl.BlockSpec((hid, C), lambda n, t: (0, 0)),
        ],
        out_specs=pl.BlockSpec((None, None, hid, 2), lambda n, t: (n, t, 0, 0)),
        compiler_params=cparams,
    )(x3d, w2d)

    # Tiny (N*T, hid, 2) reduction + folded affine, all in f32 (plain XLA).
    stats = jnp.sum(partial_stats, axis=(0, 1))            # (hid, 2)
    count = float(N * HW)
    mean = stats[:, 0] / count
    var = jnp.maximum(stats[:, 1] / count - mean * mean, 0.0)  # biased variance
    scale = gamma.astype(jnp.float32) * jax.lax.rsqrt(var + EPS)
    shift = beta.astype(jnp.float32) - mean * scale
    ss = jnp.stack([scale, shift]).reshape(2, hid, 1)

    # ---- Pass 2: recompute 1x1 conv, apply scale/shift + ReLU. ----
    out3d = pl.pallas_call(
        _apply_kernel,
        out_shape=jax.ShapeDtypeStruct((N, hid, HW), out_dtype),
        grid=(N, T),
        in_specs=[
            pl.BlockSpec((None, C, tile_hw), lambda n, t: (n, 0, t)),
            pl.BlockSpec((hid, C), lambda n, t: (0, 0)),
            pl.BlockSpec((2, hid, 1), lambda n, t: (0, 0, 0)),
        ],
        out_specs=pl.BlockSpec((None, hid, tile_hw), lambda n, t: (n, 0, t)),
        compiler_params=cparams,
    )(x3d, w2d, ss)

    return out3d.reshape(N, hid, H, W)   # NCHW; reshape only, no transpose


def _reference(x_nchw, conv_w, gamma, beta, matmul_dtype=jnp.float32):
    """Pure-JAX Conv2d(1x1, bias=False) -> BatchNorm2d(train) -> ReLU."""
    N, C, H, W = x_nchw.shape
    hid = conv_w.shape[0]
    xm = x_nchw.astype(matmul_dtype).astype(jnp.float32)
    wm = conv_w.reshape(hid, C).astype(matmul_dtype).astype(jnp.float32)
    y = jnp.einsum("nchw,oc->nohw", xm, wm)
    mean = jnp.mean(y, axis=(0, 2, 3), keepdims=True)
    var = jnp.mean((y - mean) ** 2, axis=(0, 2, 3), keepdims=True)
    y = (y - mean) * jax.lax.rsqrt(var + EPS)
    y = y * gamma.reshape(1, hid, 1, 1) + beta.reshape(1, hid, 1, 1)
    return jnp.maximum(y, 0.0)


if __name__ == "__main__":
    # Small shapes consistent with the module's forward pass.
    N, dim, H, W = 2, 4, 16, 16
    hidden_dim = 32

    key = jax.random.PRNGKey(0)
    kx, kw = jax.random.split(key)

    x = jax.random.normal(kx, (N, dim, H, W), dtype=jnp.float32)

    # Deterministic param init (Conv2d kaiming-uniform-like bounds; BN defaults).
    fan_in = dim * 1 * 1
    bound = (1.0 / fan_in) ** 0.5
    conv_w = jax.random.uniform(
        kw, (hidden_dim, dim, 1, 1), minval=-bound, maxval=bound, dtype=jnp.float32
    )
    gamma = jnp.ones((hidden_dim,), dtype=jnp.float32)
    beta = jnp.zeros((hidden_dim,), dtype=jnp.float32)

    out = cnn_feedforward(x, conv_w, gamma, beta)
    out = jax.block_until_ready(out)
    assert out.shape == (N, hidden_dim, H, W), out.shape

    # Reference with the matmul inputs rounded to bf16 exactly as the kernel
    # does (all other math in f32) -- the bf16 MXU cast is a deliberate perf
    # choice from the review; everything else must match tightly.
    ref = _reference(x, conv_w, gamma, beta, matmul_dtype=jnp.bfloat16)
    assert jnp.allclose(out, ref, atol=1e-4, rtol=1e-4), "mismatch vs reference"

    print("KERNEL_OK")
</pallas_src>

<mosaic_0001>
module attributes {stable_mosaic.version = 11 : i64} {
  func.func @_stats_kernel(%arg0: i32, %arg1: i32, %arg2: memref<1x4x256xbf16, #tpu.memory_space<vmem>>, %arg3: memref<32x4xbf16, #tpu.memory_space<vmem>>, %arg4: memref<1x1x32x2xf32, #tpu.memory_space<vmem>>) attributes {dimension_semantics = [#tpu.dimension_semantics<parallel>, #tpu.dimension_semantics<parallel>], iteration_bounds = array<i64: 2, 1>, scalar_prefetch = 0 : i64, scratch_operands = 0 : i64, tpu.core_type = #tpu.core_type<tc>, window_params = [{transform_indices = @transform_0, window_bounds = array<i64: 1, 4, 256>}, {pipeline_mode = #tpu.pipeline_mode<synchronous>, transform_indices = @transform_1, window_bounds = array<i64: 32, 4>}, {transform_indices = @transform_2, window_bounds = array<i64: 1, 1, 32, 2>}]} {
    %c0 = arith.constant 0 : index
    %c0_0 = arith.constant 0 : index
    %0 = vector.load %arg3[%c0, %c0_0] : memref<32x4xbf16, #tpu.memory_space<vmem>>, vector<32x4xbf16>
    %c0_1 = arith.constant 0 : index
    %c0_2 = arith.constant 0 : index
    %c0_3 = arith.constant 0 : index
    %1 = vector.load %arg2[%c0_1, %c0_2, %c0_3] : memref<1x4x256xbf16, #tpu.memory_space<vmem>>, vector<1x4x256xbf16>
    %2 = vector.shape_cast %1 : vector<1x4x256xbf16> to vector<4x256xbf16>
    %cst = arith.constant dense<0.000000e+00> : vector<32x256xf32>
    %3 = tpu.matmul %0, %2, %cst {dimension_numbers = #tpu.dot_dimension_numbers<[1], [0], [0], [1], [0, 0, 1, 1], [], []>} : vector<32x4xbf16>, vector<4x256xbf16>, vector<32x256xf32> -> vector<32x256xf32>
    %cst_4 = arith.constant dense<0.000000e+00> : vector<32xf32>
    %4 = vector.multi_reduction <add>, %3, %cst_4 [1] : vector<32x256xf32> to vector<32xf32>
    %5 = vector.shape_cast %4 : vector<32xf32> to vector<32x1xf32>
    %6 = arith.mulf %3, %3 : vector<32x256xf32>
    %cst_5 = arith.constant dense<0.000000e+00> : vector<32xf32>
    %7 = vector.multi_reduction <add>, %6, %cst_5 [1] : vector<32x256xf32> to vector<32xf32>
    %8 = vector.shape_cast %7 : vector<32xf32> to vector<32x1xf32>
    %9 = tpu.concatenate %5, %8 in 1 : vector<32x1xf32>, vector<32x1xf32> -> vector<32x2xf32>
    %c0_6 = arith.constant 0 : index
    %c0_7 = arith.constant 0 : index
    %c0_8 = arith.constant 0 : index
    %c0_9 = arith.constant 0 : index
    %10 = vector.load %arg4[%c0_6, %c0_7, %c0_8, %c0_9] : memref<1x1x32x2xf32, #tpu.memory_space<vmem>>, vector<1x1x32x2xf32>
    %11 = vector.shape_cast %10 : vector<1x1x32x2xf32> to vector<32x2xf32>
    %12 = vector.shape_cast %9 : vector<32x2xf32> to vector<1x1x32x2xf32>
    tpu.vector_store %arg4[%c0_6, %c0_7, %c0_8, %c0_9], %12 {strides = array<i32>} : memref<1x1x32x2xf32, #tpu.memory_space<vmem>>, vector<1x1x32x2xf32>,
    return
  }
  func.func @transform_0(%arg0: i32, %arg1: i32) -> (i32, i32, i32) {
    %c0_i32 = arith.constant 0 : i32
    %c0_i32_0 = arith.constant 0 : i32
    return %arg0, %c0_i32, %arg1 : i32, i32, i32
  }
  func.func @transform_1(%arg0: i32, %arg1: i32) -> (i32, i32) {
    %c0_i32 = arith.constant 0 : i32
    %c0_i32_0 = arith.constant 0 : i32
    %c0_i32_1 = arith.constant 0 : i32
    return %c0_i32, %c0_i32_0 : i32, i32
  }
  func.func @transform_2(%arg0: i32, %arg1: i32) -> (i32, i32, i32, i32) {
    %c0_i32 = arith.constant 0 : i32
    %c0_i32_0 = arith.constant 0 : i32
    %c0_i32_1 = arith.constant 0 : i32
    return %arg0, %arg1, %c0_i32, %c0_i32_0 : i32, i32, i32, i32
  }
}

module attributes {stable_mosaic.version = 11 : i64} {
  func.func @_apply_kernel(%arg0: i32, %arg1: i32, %arg2: memref<1x4x256xbf16, #tpu.memory_space<vmem>>, %arg3: memref<32x4xbf16, #tpu.memory_space<vmem>>, %arg4: memref<2x32x1xf32, #tpu.memory_space<vmem>>, %arg5: memref<1x32x256xf32, #tpu.memory_space<vmem>>) attributes {dimension_semantics = [#tpu.dimension_semantics<parallel>, #tpu.dimension_semantics<parallel>], iteration_bounds = array<i64: 2, 1>, scalar_prefetch = 0 : i64, scratch_operands = 0 : i64, tpu.core_type = #tpu.core_type<tc>, window_params = [{transform_indices = @transform_0, window_bounds = array<i64: 1, 4, 256>}, {pipeline_mode = #tpu.pipeline_mode<synchronous>, transform_indices = @transform_1, window_bounds = array<i64: 32, 4>}, {pipeline_mode = #tpu.pipeline_mode<synchronous>, transform_indices = @transform_2, window_bounds = array<i64: 2, 32, 1>}, {transform_indices = @transform_3, window_bounds = array<i64: 1, 32, 256>}]} {
    %c0 = arith.constant 0 : index
    %c0_0 = arith.constant 0 : index
    %0 = vector.load %arg3[%c0, %c0_0] : memref<32x4xbf16, #tpu.memory_space<vmem>>, vector<32x4xbf16>
    %c0_1 = arith.constant 0 : index
    %c0_2 = arith.constant 0 : index
    %c0_3 = arith.constant 0 : index
    %1 = vector.load %arg2[%c0_1, %c0_2, %c0_3] : memref<1x4x256xbf16, #tpu.memory_space<vmem>>, vector<1x4x256xbf16>
    %2 = vector.shape_cast %1 : vector<1x4x256xbf16> to vector<4x256xbf16>
    %cst = arith.constant dense<0.000000e+00> : vector<32x256xf32>
    %3 = tpu.matmul %0, %2, %cst {dimension_numbers = #tpu.dot_dimension_numbers<[1], [0], [0], [1], [0, 0, 1, 1], [], []>} : vector<32x4xbf16>, vector<4x256xbf16>, vector<32x256xf32> -> vector<32x256xf32>
    %c0_4 = arith.constant 0 : index
    %c0_5 = arith.constant 0 : index
    %c0_6 = arith.constant 0 : index
    %4 = vector.load %arg4[%c0_4, %c0_5, %c0_6] : memref<2x32x1xf32, #tpu.memory_space<vmem>>, vector<1x32x1xf32>
    %5 = vector.shape_cast %4 : vector<1x32x1xf32> to vector<32x1xf32>
    %c1 = arith.constant 1 : index
    %c0_7 = arith.constant 0 : index
    %c0_8 = arith.constant 0 : index
    %6 = vector.load %arg4[%c1, %c0_7, %c0_8] : memref<2x32x1xf32, #tpu.memory_space<vmem>>, vector<1x32x1xf32>
    %7 = vector.shape_cast %6 : vector<1x32x1xf32> to vector<32x1xf32>
    %8 = vector.broadcast %5 : vector<32x1xf32> to vector<32x256xf32>
    %9 = arith.mulf %3, %8 : vector<32x256xf32>
    %10 = vector.broadcast %7 : vector<32x1xf32> to vector<32x256xf32>
    %11 = arith.addf %9, %10 : vector<32x256xf32>
    %cst_9 = arith.constant 0.000000e+00 : f32
    %12 = vector.broadcast %cst_9 : f32 to vector<32x256xf32>
    %13 = arith.maximumf %11, %12 : vector<32x256xf32>
    %c0_10 = arith.constant 0 : index
    %c0_11 = arith.constant 0 : index
    %c0_12 = arith.constant 0 : index
    %14 = vector.load %arg5[%c0_10, %c0_11, %c0_12] : memref<1x32x256xf32, #tpu.memory_space<vmem>>, vector<1x32x256xf32>
    %15 = vector.shape_cast %14 : vector<1x32x256xf32> to vector<32x256xf32>
    %16 = vector.shape_cast %13 : vector<32x256xf32> to vector<1x32x256xf32>
    tpu.vector_store %arg5[%c0_10, %c0_11, %c0_12], %16 {strides = array<i32>} : memref<1x32x256xf32, #tpu.memory_space<vmem>>, vector<1x32x256xf32>,
    return
  }
  func.func @transform_0(%arg0: i32, %arg1: i32) -> (i32, i32, i32) {
    %c0_i32 = arith.constant 0 : i32
    %c0_i32_0 = arith.constant 0 : i32
    return %arg0, %c0_i32, %arg1 : i32, i32, i32
  }
  func.func @transform_1(%arg0: i32, %arg1: i32) -> (i32, i32) {
    %c0_i32 = arith.constant 0 : i32
    %c0_i32_0 = arith.constant 0 : i32
    %c0_i32_1 = arith.constant 0 : i32
    return %c0_i32, %c0_i32_0 : i32, i32
  }
  func.func @transform_2(%arg0: i32, %arg1: i32) -> (i32, i32, i32) {
    %c0_i32 = arith.constant 0 : i32
    %c0_i32_0 = arith.constant 0 : i32
    %c0_i32_1 = arith.constant 0 : i32
    %c0_i32_2 = arith.constant 0 : i32
    return %c0_i32, %c0_i32_0, %c0_i32_1 : i32, i32, i32
  }
  func.func @transform_3(%arg0: i32, %arg1: i32) -> (i32, i32, i32) {
    %c0_i32 = arith.constant 0 : i32
    %c0_i32_0 = arith.constant 0 : i32
    return %arg0, %c0_i32, %arg1 : i32, i32, i32
  }
}

</mosaic_0001>

<bundles_post_ra>
// kernel: cnn_feedforward.3
= control target key start
LH: loop header
LB: loop body
LE: loop exit
PB: predicated region body
PF: predicated region fallthrough
CT: control target
= control target key end

     0   :  { %s554_s12 = smov 0   ;;  %s556_s13 = smov 0   ;;  %s631_s0 = inlined_call_operand.vmem [shape: bf16[2,4,256], index: 0, kind: input, shape index: {}]   ;;  %s632_s1 = inlined_call_operand.vmem [shape: bf16[32,4], index: 1, kind: input, shape index: {}]   ;;  %s633_s2 = inlined_call_operand.vmem [shape: f32[2,32,1], index: 2, kind: input, shape index: {}]   ;;  %s634_s3 = inlined_call_operand.vmem [shape: f32[2,32,256], index: 3, kind: output, shape index: {}]  }
   0x1   :  { %s558_s14 = smov 0  }
   0x2 LB: > { %s25_s15 = sadd.s32 1, %s527_s13  ;;  %p452_p0 = scmp.ge.s32.totalorder %s531_s14, 1  ;;  %s531_s14 = sphi %s558_s14, %s13_s14   ;;  %s527_s13 = sphi %s556_s13, %s636_s13   ;;  %s523_s12 = sphi %s554_s12, %s635_s12  }
   0x3   : > { %p27_p1 = scmp.ge.s32.totalorder %s25_s15, 2  ;;  %p158_p2 = scmp.lt.s32.totalorder %s531_s14, 3 }
   0x5   : > { %s638_s15 = smov (%p27_p1, %s25_s15), 0  ;;  %p159_p3 = pnand %p452_p0, %p158_p2 }
   0x6   : > { %p191_p4 = scmp.lt.s32.totalorder (!%p159_p3), %s523_s12, 1 }
   0x7   : > { %162 = sbr.rel (%p159_p3) target bundleno = 176 (0xb0), region = 32 }
   0xc   : > { %v282_v0 = vld [vmem:[%s633_s2 + $0x10] sm:$0xff]  ;;  %v280_v1 = vld [vmem:[%s633_s2] sm:$0xff]  ;;  %v533_v2 = vmov 0   ;;  %s640_s12 = smov (!%p191_p4, %s523_s12), 1  ;;  %v283_v5 = vld [vmem:[%s633_s2 + $0x18] sm:$0xff]  ;;  %vm237_vm0 = vcmask 1041408  }
   0xd   : > { %507 = vset.pattern.permute.xlu1 %v533_v2  ;;  %506 = vset.pattern.permute.xlu0 %v533_v2  ;;  %v469_v3 = vld [vmem:[%s633_s2 + $0x20] sm:$0xff]  ;;  %s475_s22 = sshll.u32 %s640_s12, 2  ;;  %v281_v6 = vld [vmem:[%s633_s2 + $0x8] sm:$0xff]  ;;  %v472_v14 = vld [vmem:[%s633_s2 + $0x38] sm:$0xff]  ;;  %vm230_vm1 = vcmask 31744   ;;  %s476_s17 = sshll.u32 %s640_s12, 6 }
   0xe   : > { %301 = vperm.xlu1 %507, %v282_v0   ;;  %291 = vperm.xlu0 %506, %v280_v1   ;;  %s198_s25 = scalar_lea.vmem %s631_s0, %s475_s22  ;;  %v470_v7 = vld [vmem:[%s633_s2 + $0x28] sm:$0xff]  ;;  %v477_v8 = vld [vmem:[%s632_s1] sm:$0xff]  ;;  %v471_v15 = vld [vmem:[%s633_s2 + $0x30] sm:$0xff]  ;;  %s612_s20 = scalar_lea.vmem %s634_s3, %s476_s17 }
   0xf   : > { %508 = vset.pattern.permute.xlu2 %v533_v2  ;;  %v215_v4 = vld [vmem:[%s198_s25] sm:$0xf]  ;;  %v478_v13 = vld [vmem:[%s632_s1 + $0x8] sm:$0xff] }
  0x10   : > { %319 = vperm.xlu2 %508, %v469_v3   ;;  %227 = vst [vmem:[#allocation1] ss:$4 sm:$0xff] %v215_v4 }
  0x16   : > { %306 = vperm.xlu1 %507, %v283_v5   ;;  %296 = vperm.xlu0 %506, %v281_v6  }
  0x17   : > { %v228_v9 = vld.sshfl [vmem:[#allocation1] sm:$0xff pattern:$0x73625140]  ;;  %v229_v10 = vld.sshfl [vmem:[#allocation1 + $0x8] sm:$0xff pattern:$0x73625140] }
  0x18   : > { %324 = vperm.xlu2 %508, %v470_v7   ;;  %v238_v11 = vsel %vm237_vm0, %v228_v9, 0  ;;  %v240_v12 = vsel %vm237_vm0, %v229_v10, 0 }
  0x19   : > { %249 = vmatpush.bf16.msra.mxu0 %v238_v11  ;;  %479 = vmatpush.bf16.msra.mxu2 %v238_v11 }
  0x1a   : > { %268 = vmatpush.bf16.msra.mxu1 %v240_v12  ;;  %480 = vmatpush.bf16.msra.mxu3 %v240_v12 }
  0x1c   : > { %465 = vmatmul.msk.bf16.vlgmr.msra.gmra.mxu0 %vm230_vm1, %v477_v8  ;;  %466 = vmatmul.msk.bf16.vlgmr.msra.gmra.mxu2 %vm230_vm1, %v478_v13 }
  0x1d   : > { %467 = vmatmul.msk.bf16.vlgmr.msra.gmra.mxu1 %vm230_vm1, %v477_v8  ;;  %468 = vmatmul.msk.bf16.vlgmr.msra.gmra.mxu3 %vm230_vm1, %v478_v13 }
  0x1e   : > { %334 = vperm.xlu1 %507, %v472_v14   ;;  %329 = vperm.xlu0 %506, %v471_v15  }
  0x6a   : > { %v320_v19 = vpop.permute.xlu2 %319 }
  0x72   : > { %v325_v39 = vpop.permute.xlu2 %324 }
  0x80   : > { %v292_v16 = vpop.permute.xlu0 %291  ;;  %v302_v17 = vpop.permute.xlu1 %301 }
  0x88   : > { %v297_v18 = vpop.permute.xlu0 %296  ;;  %v307_v27 = vpop.permute.xlu1 %306 }
  0x90   : > { %v330_v32 = vpop.permute.xlu0 %329  ;;  %v335_v50 = vpop.permute.xlu1 %334 }
  0x99   : > { %v251_v20 = vpop.f32.mrf.mxu0 }
  0x9a   : > { %v309_v21 = vmul.f32 %v292_v16, %v251_v20  ;;  %v270_v22 = vpop.f32.mrf.mxu1 }
  0x9b   : > { %v310_v23 = vmul.f32 %v292_v16, %v270_v22 }
  0x9c   : > { %v337_v24 = vadd.f32 %v320_v19, %v309_v21 }
  0x9d   : > { %v338_v25 = vadd.f32 %v320_v19, %v310_v23 }
  0x9e   : > { %v345_v26 = vmax.f32 %v337_v24, 0.0 }
  0x9f   : > { %v346_v28 = vmax.f32 %v338_v25, 0.0  ;;  %v256_v29 = vpop.f32.mrf.mxu2 }
  0xa0   : > { %353 = vst [vmem:[%s612_s20] sm:$0xff] %v345_v26  ;;  %v313_v30 = vmul.f32 %v302_v17, %v256_v29  ;;  %v275_v31 = vpop.f32.mrf.mxu3 }
  0xa1   : > { %354 = vst [vmem:[%s612_s20 + $0x8] sm:$0xff] %v346_v28  ;;  %v314_v33 = vmul.f32 %v302_v17, %v275_v31  ;;  %v253_v34 = vpop.f32.mrf.mxu0 }
  0xa2   : > { %v341_v35 = vadd.f32 %v330_v32, %v313_v30  ;;  %v311_v36 = vmul.f32 %v297_v18, %v253_v34  ;;  %v272_v37 = vpop.f32.mrf.mxu1 }
  0xa3   : > { %v342_v38 = vadd.f32 %v330_v32, %v314_v33  ;;  %v312_v40 = vmul.f32 %v297_v18, %v272_v37 }
  0xa4   : > { %v349_v41 = vmax.f32 %v341_v35, 0.0  ;;  %v339_v42 = vadd.f32 %v325_v39, %v311_v36 }
  0xa5   : > { %v350_v43 = vmax.f32 %v342_v38, 0.0  ;;  %v340_v44 = vadd.f32 %v325_v39, %v312_v40 }
  0xa6   : > { %357 = vst [vmem:[%s612_s20 + $0x20] sm:$0xff] %v349_v41  ;;  %v347_v45 = vmax.f32 %v339_v42, 0.0 }
  0xa7   : > { %358 = vst [vmem:[%s612_s20 + $0x28] sm:$0xff] %v350_v43  ;;  %v348_v46 = vmax.f32 %v340_v44, 0.0  ;;  %v258_v47 = vpop.f32.mrf.mxu2 }
  0xa8   : > { %355 = vst [vmem:[%s612_s20 + $0x10] sm:$0xff] %v347_v45  ;;  %v315_v48 = vmul.f32 %v307_v27, %v258_v47  ;;  %v277_v49 = vpop.f32.mrf.mxu3 }
  0xa9   : > { %356 = vst [vmem:[%s612_s20 + $0x18] sm:$0xff] %v348_v46  ;;  %v316_v51 = vmul.f32 %v307_v27, %v277_v49 }
  0xaa   : > { %v343_v52 = vadd.f32 %v335_v50, %v315_v48 }
  0xab   : > { %v344_v53 = vadd.f32 %v335_v50, %v316_v51 }
  0xac   : > { %v351_v54 = vmax.f32 %v343_v52, 0.0 }
  0xad   : > { %v352_v55 = vmax.f32 %v344_v53, 0.0 }
  0xae   : > { %359 = vst [vmem:[%s612_s20 + $0x30] sm:$0xff] %v351_v54 }
  0xaf   : > { %360 = vst [vmem:[%s612_s20 + $0x38] sm:$0xff] %v352_v55 }
  0xb0 PF: > { %s13_s14 = sadd.s32 1, %s531_s14   ;;  %s635_s12 = smov %s527_s13 }
  0xb1   : > { %p10_p5 = scmp.ge.s32.totalorder %s13_s14, 4   ;;  %s636_s13 = smov %s638_s15 }
  0xb3   :  { %12 = sbr.rel (!%p10_p5) target bundleno = 2 (0x2), region = 63 }

// kernel: cnn_feedforward.2
= control target key start
LH: loop header
LB: loop body
LE: loop exit
PB: predicated region body
PF: predicated region fallthrough
CT: control target
= control target key end

     0   :  { %s475_s9 = smov 0   ;;  %s477_s10 = smov 0   ;;  %s522_s0 = inlined_call_operand.vmem [shape: bf16[2,4,256], index: 0, kind: input, shape index: {}]   ;;  %s523_s1 = inlined_call_operand.vmem [shape: bf16[32,4], index: 1, kind: input, shape index: {}]   ;;  %s524_s2 = inlined_call_operand.vmem [shape: f32[2,1,32,2], index: 2, kind: output, shape index: {}]  }
   0x1   :  { %s479_s11 = smov 0  }
   0x2 LB: > { %s24_s12 = sadd.s32 1, %s454_s10  ;;  %p387_p0 = scmp.ge.s32.totalorder %s458_s11, 1  ;;  %s458_s11 = sphi %s479_s11, %s12_s11   ;;  %s454_s10 = sphi %s477_s10, %s526_s10   ;;  %s450_s9 = sphi %s475_s9, %s525_s9  }
   0x3   : > { %p26_p1 = scmp.ge.s32.totalorder %s24_s12, 2  ;;  %p133_p2 = scmp.lt.s32.totalorder %s458_s11, 3 }
   0x5   : > { %s528_s12 = smov (%p26_p1, %s24_s12), 0  ;;  %p134_p3 = pnand %p387_p0, %p133_p2 }
   0x6   : > { %p164_p4 = scmp.lt.s32.totalorder (!%p134_p3), %s450_s9, 1 }
   0x7   : > { %137 = sbr.rel (%p134_p3) target bundleno = 297 (0x129), region = 28 }
   0xc   : > { %s530_s9 = smov (!%p164_p4, %s450_s9), 1  ;;  %vm209_vm0 = vcmask 1041408   ;;  %v408_v5 = vld [vmem:[%s523_s1] sm:$0xff]  ;;  %v409_v6 = vld [vmem:[%s523_s1 + $0x8] sm:$0xff]  ;;  %vm202_vm1 = vcmask 31744   ;;  %vm284_vm2 = vcmask 7168  }
   0xd   : > { %s406_s13 = sshll.u32 %s530_s9, 2  ;;  %s407_s21 = sshll.u32 %s530_s9, 5  ;;  %vm289_vm3 = vcmask 15360  }
   0xe   : > { %s171_s16 = scalar_lea.vmem %s522_s0, %s406_s13  ;;  %s181_s24 = scalar_lea.vmem %s524_s2, %s407_s21 }
   0xf   : > { %v187_v0 = vld [vmem:[%s171_s16] sm:$0xf] }
  0x10   : > { %199 = vst [vmem:[#allocation1] ss:$4 sm:$0xff] %v187_v0 }
  0x17   : > { %v200_v1 = vld.sshfl [vmem:[#allocation1] sm:$0xff pattern:$0x73625140]  ;;  %v201_v2 = vld.sshfl [vmem:[#allocation1 + $0x8] sm:$0xff pattern:$0x73625140] }
  0x18   : > { %v210_v3 = vsel %vm209_vm0, %v200_v1, 0  ;;  %v212_v4 = vsel %vm209_vm0, %v201_v2, 0 }
  0x19   : > { %221 = vmatpush.bf16.msra.mxu0 %v210_v3  ;;  %410 = vmatpush.bf16.msra.mxu2 %v210_v3 }
  0x1a   : > { %240 = vmatpush.bf16.msra.mxu1 %v212_v4  ;;  %411 = vmatpush.bf16.msra.mxu3 %v212_v4 }
  0x1c   : > { %400 = vmatmul.msk.bf16.vlgmr.msra.gmra.mxu0 %vm202_vm1, %v408_v5  ;;  %401 = vmatmul.msk.bf16.vlgmr.msra.gmra.mxu2 %vm202_vm1, %v409_v6 }
  0x1d   : > { %402 = vmatmul.msk.bf16.vlgmr.msra.gmra.mxu1 %vm202_vm1, %v408_v5  ;;  %403 = vmatmul.msk.bf16.vlgmr.msra.gmra.mxu3 %vm202_vm1, %v409_v6 }
  0x99   : > { %v223_v7 = vpop.f32.mrf.mxu0 }
  0x9a   : > { %v264_v8 = vmul.f32 %v223_v7, %v223_v7  ;;  %v242_v9 = vpop.f32.mrf.mxu1 }
  0x9b   : > { %v265_v10 = vmul.f32 %v242_v9, %v242_v9  ;;  %v252_v11 = vadd.f32 %v242_v9, %v223_v7 }
  0x9d   : > { %253 = vadd.xlane.f32.xlu0 %v252_v11  ;;  %v272_v12 = vadd.f32 %v265_v10, %v264_v8 }
  0x9f   : > { %273 = vadd.xlane.f32.xlu2 %v272_v12  ;;  %v228_v13 = vpop.f32.mrf.mxu2 }
  0xa0   : > { %v247_v14 = vpop.f32.mrf.mxu3  ;;  %v268_v22 = vmul.f32 %v228_v13, %v228_v13 }
  0xa1   : > { %v225_v15 = vpop.f32.mrf.mxu0  ;;  %v258_v16 = vadd.f32 %v247_v14, %v228_v13  ;;  %v269_v23 = vmul.f32 %v247_v14, %v247_v14 }
  0xa2   : > { %v266_v17 = vmul.f32 %v225_v15, %v225_v15  ;;  %v244_v18 = vpop.f32.mrf.mxu1 }
  0xa3   : > { %v255_v19 = vadd.f32 %v244_v18, %v225_v15  ;;  %v267_v20 = vmul.f32 %v244_v18, %v244_v18  ;;  %259 = vadd.xlane.f32.xlu1 %v258_v16  ;;  %v278_v27 = vadd.f32 %v269_v23, %v268_v22 }
  0xa5   : > { %256 = vadd.xlane.f32.xlu0 %v255_v19  ;;  %v275_v21 = vadd.f32 %v267_v20, %v266_v17 }
  0xa7   : > { %276 = vadd.xlane.f32.xlu2 %v275_v21  ;;  %v230_v24 = vpop.f32.mrf.mxu2 }
  0xa8   : > { %v249_v25 = vpop.f32.mrf.mxu3  ;;  %v270_v28 = vmul.f32 %v230_v24, %v230_v24 }
  0xa9   : > { %v261_v26 = vadd.f32 %v249_v25, %v230_v24  ;;  %v271_v29 = vmul.f32 %v249_v25, %v249_v25 }
  0xab   : > { %262 = vadd.xlane.f32.xlu1 %v261_v26  ;;  %v281_v30 = vadd.f32 %v271_v29, %v270_v28 }
  0xad   : > { %279 = vadd.xlane.f32.xlu0 %v278_v27 }
  0xb3   : > { %282 = vadd.xlane.f32.xlu1 %v281_v30 }
 0x110   : > { %v254_v31 = vpop.xlane.xlu0 %253 }
 0x112   : > { %v274_v32 = vpop.xlane.xlu2 %273 }
 0x113   : > { %v285_v33 = vsel %vm284_vm2, %v254_v31, %v274_v32 }
 0x114   : > { %290 = vst.msk [vmem:[%s181_s24] sm:$0xff] %vm289_vm3, %v285_v33 }
 0x116   : > { %v260_v34 = vpop.xlane.xlu1 %259 }
 0x118   : > { %v257_v35 = vpop.xlane.xlu0 %256 }
 0x11a   : > { %v277_v36 = vpop.xlane.xlu2 %276 }
 0x11b   : > { %v286_v37 = vsel %vm284_vm2, %v257_v35, %v277_v36 }
 0x11c   : > { %291 = vst.msk [vmem:[%s181_s24 + $0x8] sm:$0xff] %vm289_vm3, %v286_v37 }
 0x11e   : > { %v263_v38 = vpop.xlane.xlu1 %262 }
 0x120   : > { %v280_v39 = vpop.xlane.xlu0 %279 }
 0x121   : > { %v287_v40 = vsel %vm284_vm2, %v260_v34, %v280_v39 }
 0x122   : > { %292 = vst.msk [vmem:[%s181_s24 + $0x10] sm:$0xff] %vm289_vm3, %v287_v40 }
 0x126   : > { %v283_v41 = vpop.xlane.xlu1 %282 }
 0x127   : > { %v288_v42 = vsel %vm284_vm2, %v263_v38, %v283_v41 }
 0x128   : > { %293 = vst.msk [vmem:[%s181_s24 + $0x18] sm:$0xff] %vm289_vm3, %v288_v42 }
 0x129 PF: > { %s12_s11 = sadd.s32 1, %s458_s11   ;;  %s525_s9 = smov %s454_s10 }
 0x12a   : > { %p9_p5 = scmp.ge.s32.totalorder %s12_s11, 4   ;;  %s526_s10 = smov %s528_s12 }
 0x12c   :  { %11 = sbr.rel (!%p9_p5) target bundleno = 2 (0x2), region = 58 }

</bundles_post_ra>
